<compile_context>
chip_gen: v6e
topology: v6e:2x2x1
jax: 0.10.0
libtpu: 0.0.40
codegen_flags: <defaults>
</compile_context>

<pallas_src>
import jax
import jax.numpy as jnp
from jax import lax
from jax.experimental import pallas as pl
from jax.experimental.pallas import tpu as pltpu

EPS = 1e-5  # nn.GroupNorm default eps


def _make_kernel(H, W, C, K, G):
    WC = W * C
    CG = C // G
    PAD = K // 2
    inv_n = 1.0 / float(H * W * CG)

    def kernel(x_ref, pool_ref, g1_ref, b1_ref, w1_ref, cb1_ref,
               g2_ref, b2_ref, w2_ref, cb2_ref, o_ref):
        x = x_ref[0]                       # (H, W*C) f32, lane-dense
        pool = pool_ref[...]               # (W*C, W*C) 0/1 group-membership

        def gn_silu(h, gamma, beta):
            # Column sums over H (sublane reduce), then pool over (w, channels
            # within group) with one small matmul against the hoisted `pool`.
            s1 = jnp.sum(h, axis=0, keepdims=True)                        # (1, WC)
            mean = jnp.dot(s1, pool, preferred_element_type=jnp.float32) * inv_n
            d = h - mean                                                  # centered
            s2 = jnp.sum(d * d, axis=0, keepdims=True)                    # (1, WC)
            var = jnp.dot(s2, pool, preferred_element_type=jnp.float32) * inv_n
            a = lax.rsqrt(var + EPS) * gamma                              # folded affine
            y = d * a + beta
            # SiLU: exp (EUP) + approx reciprocal (EUP) instead of a VPU divide.
            return y * pl.reciprocal(1.0 + jnp.exp(-y), approx=True)

        def conv(h, w_ref, bias):
            # Zero-pad H (rows) only; W padding is baked into the banded weight.
            hb = h.astype(jnp.bfloat16)
            zrow = jnp.zeros((PAD, WC), jnp.bfloat16)
            hp = jnp.concatenate([zrow, hb, zrow], axis=0)                # (H+2P, WC)
            # K row-shifted views (value slices, no scratch / hidden VMEM copies)
            taps = [hp[kh:kh + H, :] for kh in range(K)]
            xcat = jnp.concatenate(taps, axis=1)                          # (H, K*WC) bf16
            out = jnp.dot(xcat, w_ref[...],
                          preferred_element_type=jnp.float32)             # (H, WC) f32
            return out + bias

        h = gn_silu(x, g1_ref[...], b1_ref[...])
        h = conv(h, w1_ref, cb1_ref[...])
        h = gn_silu(h, g2_ref[...], b2_ref[...])
        h = conv(h, w2_ref, cb2_ref[...])
        o_ref[0] = h + x                  # residual; full-lane (unmasked) store

    return kernel


def _banded_conv_weight(w_oihw, W):
    """(C_out, C_in, K, K) OIHW -> (K*W*C_in, W*C_out) bf16 block-banded matrix.

    Row index = kh*(W*C) + w_in*C + ci   (matches the in-kernel lane concat)
    Col index = w_out*C + co
    Entry     = weight[co, ci, kh, kw] with kw = w_in - w_out + K//2,
                zero when kw is outside [0, K)  (== "SAME" zero padding in W).
    """
    C_out, C_in, K, _ = w_oihw.shape
    PAD = K // 2
    wh = jnp.transpose(w_oihw, (2, 3, 1, 0)).astype(jnp.float32)  # (kh, kw, ci, co)
    kw = jnp.arange(K)[:, None, None]
    w_in = jnp.arange(W)[None, :, None]
    w_out = jnp.arange(W)[None, None, :]
    sel = (w_in == w_out + kw - PAD).astype(jnp.float32)          # (K, W_in, W_out)
    big = jnp.einsum('hxio,xab->haibo', wh, sel)                  # (K, Wi, Ci, Wo, Co)
    return big.reshape(K * W * C_in, W * C_out).astype(jnp.bfloat16)


def _tile_channels(v, W):
    # per-channel vector (C,) -> lane-dense (1, W*C), index w*C + c
    C = v.shape[0]
    return jnp.tile(v.astype(jnp.float32), W).reshape(1, W * C)


def resblock_forward_nhwc(x_nhwc, params):
    """Fused ResBlock on NHWC input (preferred layout: no boundary transposes)."""
    B, H, W, C = x_nhwc.shape
    K = params["w1"].shape[-1]
    G = params["groups"]
    CG = C // G
    WC = W * C

    x = x_nhwc.reshape(B, H, WC).astype(jnp.float32)

    # Group-membership pooling matrix, hoisted out of the kernel.
    grp = (jnp.arange(WC) % C) // CG
    pool = (grp[:, None] == grp[None, :]).astype(jnp.float32)     # (WC, WC)

    w1 = _banded_conv_weight(params["w1"], W)
    w2 = _banded_conv_weight(params["w2"], W)
    g1 = _tile_channels(params["g1"], W)
    b1 = _tile_channels(params["b1"], W)
    g2 = _tile_channels(params["g2"], W)
    b2 = _tile_channels(params["b2"], W)
    cb1 = _tile_channels(params["cb1"], W)
    cb2 = _tile_channels(params["cb2"], W)

    kernel = _make_kernel(H, W, C, K, G)

    img_spec = pl.BlockSpec((1, H, WC), lambda b: (b, 0, 0))
    # Grid-invariant operands (constant index_map).  For production shapes mark
    # these pipeline_mode=pl.Buffered(1) (or DMA once into scratch) to avoid
    # double-buffered VMEM; at this size the default footprint is negligible.
    pool_spec = pl.BlockSpec((WC, WC), lambda b: (0, 0))
    vec_spec = pl.BlockSpec((1, WC), lambda b: (0, 0))
    wgt_spec = pl.BlockSpec((K * WC, WC), lambda b: (0, 0))

    out = pl.pallas_call(
        kernel,
        out_shape=jax.ShapeDtypeStruct((B, H, WC), jnp.float32),
        grid=(B,),
        in_specs=[img_spec, pool_spec,
                  vec_spec, vec_spec, wgt_spec, vec_spec,
                  vec_spec, vec_spec, wgt_spec, vec_spec],
        out_specs=img_spec,
        compiler_params=pltpu.CompilerParams(
            # Batch elements are independent -> shard across TensorCores (v7x).
            dimension_semantics=("parallel",),
            vmem_limit_bytes=32 * 1024 * 1024,
        ),
    )(x, pool, g1, b1, w1, cb1, g2, b2, w2, cb2)

    # TODO(synk): at production sizes (e.g. C=512, H=W=64) tile H (with halo
    # rows) and/or output channels across the grid instead of keeping the whole
    # image plus both banded weights VMEM-resident (v7x has only 64 MiB VMEM).
    return out.reshape(B, H, W, C)


def resblock_forward(x_nchw, params):
    """NCHW wrapper matching the PyTorch module.  Prefer resblock_forward_nhwc
    inside an NHWC model: these two transposes are full HBM read+write passes
    around an otherwise memory-bound block."""
    out = resblock_forward_nhwc(jnp.transpose(x_nchw, (0, 2, 3, 1)), params)
    return jnp.transpose(out, (0, 3, 1, 2))


def ref_resblock(x, p):
    """Pure-JAX reference mirroring the PyTorch module (NCHW, f32)."""
    G = p["groups"]

    def gn(h, gamma, beta):
        B, C, H, W = h.shape
        hg = h.reshape(B, G, C // G, H, W)
        mean = hg.mean(axis=(2, 3, 4), keepdims=True)
        var = ((hg - mean) ** 2).mean(axis=(2, 3, 4), keepdims=True)
        hn = ((hg - mean) * lax.rsqrt(var + EPS)).reshape(B, C, H, W)
        return hn * gamma[None, :, None, None] + beta[None, :, None, None]

    def silu(h):
        return h * jax.nn.sigmoid(h)

    def conv(h, w, b):
        y = lax.conv_general_dilated(h, w, (1, 1), "SAME",
                                     dimension_numbers=("NCHW", "OIHW", "NCHW"))
        return y + b[None, :, None, None]

    h = conv(silu(gn(x, p["g1"], p["b1"])), p["w1"], p["cb1"])
    h = conv(silu(gn(h, p["g2"], p["b2"])), p["w2"], p["cb2"])
    return h + x


if __name__ == "__main__":
    B, C, H, W, K = 2, 8, 16, 16, 3
    G = min(C // 4, 32)  # == 2, matching the PyTorch __init__

    key = jax.random.PRNGKey(0)
    ks = jax.random.split(key, 9)
    s = 0.1
    params = {
        "groups": G,
        "g1": 1.0 + s * jax.random.normal(ks[0], (C,), jnp.float32),
        "b1": s * jax.random.normal(ks[1], (C,), jnp.float32),
        "w1": s * jax.random.normal(ks[2], (C, C, K, K), jnp.float32),  # OIHW
        "cb1": s * jax.random.normal(ks[3], (C,), jnp.float32),
        "g2": 1.0 + s * jax.random.normal(ks[4], (C,), jnp.float32),
        "b2": s * jax.random.normal(ks[5], (C,), jnp.float32),
        "w2": s * jax.random.normal(ks[6], (C, C, K, K), jnp.float32),  # OIHW
        "cb2": s * jax.random.normal(ks[7], (C,), jnp.float32),
    }
    x = jax.random.normal(ks[8], (B, C, H, W), jnp.float32)

    out = jax.block_until_ready(resblock_forward(x, params))
    ref = ref_resblock(x, params)

    assert out.shape == x.shape
    # Tolerance accounts for bf16 MXU operands (f32 accumulation) and the
    # approximate EUP reciprocal used in SiLU; the f32 reference is exact.
    if not jnp.allclose(out, ref, atol=2e-2, rtol=2e-2):
        raise AssertionError("Pallas ResBlock does not match JAX reference")
    print("KERNEL_OK")
</pallas_src>

<mosaic_0001>
module attributes {stable_mosaic.version = 11 : i64} {
  func.func @kernel(%arg0: i32, %arg1: memref<1x16x128xf32, #tpu.memory_space<vmem>>, %arg2: memref<128x128xf32, #tpu.memory_space<vmem>>, %arg3: memref<1x128xf32, #tpu.memory_space<vmem>>, %arg4: memref<1x128xf32, #tpu.memory_space<vmem>>, %arg5: memref<384x128xbf16, #tpu.memory_space<vmem>>, %arg6: memref<1x128xf32, #tpu.memory_space<vmem>>, %arg7: memref<1x128xf32, #tpu.memory_space<vmem>>, %arg8: memref<1x128xf32, #tpu.memory_space<vmem>>, %arg9: memref<384x128xbf16, #tpu.memory_space<vmem>>, %arg10: memref<1x128xf32, #tpu.memory_space<vmem>>, %arg11: memref<1x16x128xf32, #tpu.memory_space<vmem>>) attributes {dimension_semantics = [#tpu.dimension_semantics<parallel>], iteration_bounds = array<i64: 2>, scalar_prefetch = 0 : i64, scratch_operands = 0 : i64, tpu.core_type = #tpu.core_type<tc>, window_params = [{transform_indices = @transform_0, window_bounds = array<i64: 1, 16, 128>}, {pipeline_mode = #tpu.pipeline_mode<synchronous>, transform_indices = @transform_1, window_bounds = array<i64: 128, 128>}, {pipeline_mode = #tpu.pipeline_mode<synchronous>, transform_indices = @transform_2, window_bounds = array<i64: 1, 128>}, {pipeline_mode = #tpu.pipeline_mode<synchronous>, transform_indices = @transform_3, window_bounds = array<i64: 1, 128>}, {pipeline_mode = #tpu.pipeline_mode<synchronous>, transform_indices = @transform_4, window_bounds = array<i64: 384, 128>}, {pipeline_mode = #tpu.pipeline_mode<synchronous>, transform_indices = @transform_5, window_bounds = array<i64: 1, 128>}, {pipeline_mode = #tpu.pipeline_mode<synchronous>, transform_indices = @transform_6, window_bounds = array<i64: 1, 128>}, {pipeline_mode = #tpu.pipeline_mode<synchronous>, transform_indices = @transform_7, window_bounds = array<i64: 1, 128>}, {pipeline_mode = #tpu.pipeline_mode<synchronous>, transform_indices = @transform_8, window_bounds = array<i64: 384, 128>}, {pipeline_mode = #tpu.pipeline_mode<synchronous>, transform_indices = @transform_9, window_bounds = array<i64: 1, 128>}, {transform_indices = @transform_10, window_bounds = array<i64: 1, 16, 128>}]} {
    %c0 = arith.constant 0 : index
    %c0_0 = arith.constant 0 : index
    %c0_1 = arith.constant 0 : index
    %0 = vector.load %arg1[%c0, %c0_0, %c0_1] : memref<1x16x128xf32, #tpu.memory_space<vmem>>, vector<1x16x128xf32>
    %1 = vector.shape_cast %0 : vector<1x16x128xf32> to vector<16x128xf32>
    %c0_2 = arith.constant 0 : index
    %c0_3 = arith.constant 0 : index
    %2 = vector.load %arg2[%c0_2, %c0_3] : memref<128x128xf32, #tpu.memory_space<vmem>>, vector<128x128xf32>
    %c0_4 = arith.constant 0 : index
    %c0_5 = arith.constant 0 : index
    %3 = vector.load %arg3[%c0_4, %c0_5] : memref<1x128xf32, #tpu.memory_space<vmem>>, vector<1x128xf32>
    %c0_6 = arith.constant 0 : index
    %c0_7 = arith.constant 0 : index
    %4 = vector.load %arg4[%c0_6, %c0_7] : memref<1x128xf32, #tpu.memory_space<vmem>>, vector<1x128xf32>
    %cst = arith.constant dense<0.000000e+00> : vector<128xf32>
    %5 = vector.multi_reduction <add>, %1, %cst [0] : vector<16x128xf32> to vector<128xf32>
    %6 = vector.shape_cast %5 : vector<128xf32> to vector<1x128xf32>
    %cst_8 = arith.constant dense<0.000000e+00> : vector<1x128xf32>
    %7 = tpu.matmul %6, %2, %cst_8 {dimension_numbers = #tpu.dot_dimension_numbers<[1], [0], [0], [1], [0, 0, 1, 1], [], []>} : vector<1x128xf32>, vector<128x128xf32>, vector<1x128xf32> -> vector<1x128xf32>
    %cst_9 = arith.constant 9.765625E-4 : f32
    %8 = vector.broadcast %cst_9 : f32 to vector<1x128xf32>
    %9 = arith.mulf %7, %8 : vector<1x128xf32>
    %10 = vector.broadcast %9 : vector<1x128xf32> to vector<16x128xf32>
    %11 = arith.subf %1, %10 : vector<16x128xf32>
    %12 = arith.mulf %11, %11 : vector<16x128xf32>
    %cst_10 = arith.constant dense<0.000000e+00> : vector<128xf32>
    %13 = vector.multi_reduction <add>, %12, %cst_10 [0] : vector<16x128xf32> to vector<128xf32>
    %14 = vector.shape_cast %13 : vector<128xf32> to vector<1x128xf32>
    %cst_11 = arith.constant dense<0.000000e+00> : vector<1x128xf32>
    %15 = tpu.matmul %14, %2, %cst_11 {dimension_numbers = #tpu.dot_dimension_numbers<[1], [0], [0], [1], [0, 0, 1, 1], [], []>} : vector<1x128xf32>, vector<128x128xf32>, vector<1x128xf32> -> vector<1x128xf32>
    %cst_12 = arith.constant 9.765625E-4 : f32
    %16 = vector.broadcast %cst_12 : f32 to vector<1x128xf32>
    %17 = arith.mulf %15, %16 : vector<1x128xf32>
    %cst_13 = arith.constant 9.99999974E-6 : f32
    %18 = vector.broadcast %cst_13 : f32 to vector<1x128xf32>
    %19 = arith.addf %17, %18 : vector<1x128xf32>
    %20 = math.rsqrt %19 : vector<1x128xf32>
    %21 = arith.mulf %20, %3 : vector<1x128xf32>
    %22 = vector.broadcast %21 : vector<1x128xf32> to vector<16x128xf32>
    %23 = arith.mulf %11, %22 : vector<16x128xf32>
    %24 = vector.broadcast %4 : vector<1x128xf32> to vector<16x128xf32>
    %25 = arith.addf %23, %24 : vector<16x128xf32>
    %cst_14 = arith.constant 0.000000e+00 : f32
    %26 = vector.broadcast %cst_14 : f32 to vector<16x128xf32>
    %27 = arith.subf %26, %25 : vector<16x128xf32>
    %28 = math.exp %27 : vector<16x128xf32>
    %cst_15 = arith.constant 1.000000e+00 : f32
    %29 = vector.broadcast %cst_15 : f32 to vector<16x128xf32>
    %30 = arith.addf %29, %28 : vector<16x128xf32>
    %31 = tpu.reciprocal %30 {approx = true} : vector<16x128xf32> -> vector<16x128xf32>
    %32 = arith.mulf %25, %31 : vector<16x128xf32>
    %c0_16 = arith.constant 0 : index
    %c0_17 = arith.constant 0 : index
    %33 = vector.load %arg6[%c0_16, %c0_17] : memref<1x128xf32, #tpu.memory_space<vmem>>, vector<1x128xf32>
    %34 = arith.truncf %32 : vector<16x128xf32> to vector<16x128xbf16>
    %cst_18 = arith.constant 0.000000e+00 : bf16
    %35 = vector.broadcast %cst_18 : bf16 to vector<1x128xbf16>
    %36 = tpu.concatenate %35, %34, %35 in 0 : vector<1x128xbf16>, vector<16x128xbf16>, vector<1x128xbf16> -> vector<18x128xbf16>
    %37 = vector.extract_strided_slice %36 {offsets = [0, 0], sizes = [16, 128], strides = [1, 1]} : vector<18x128xbf16> to vector<16x128xbf16>
    %38 = vector.extract_strided_slice %36 {offsets = [1, 0], sizes = [16, 128], strides = [1, 1]} : vector<18x128xbf16> to vector<16x128xbf16>
    %39 = vector.extract_strided_slice %36 {offsets = [2, 0], sizes = [16, 128], strides = [1, 1]} : vector<18x128xbf16> to vector<16x128xbf16>
    %40 = tpu.concatenate %37, %38, %39 in 1 : vector<16x128xbf16>, vector<16x128xbf16>, vector<16x128xbf16> -> vector<16x384xbf16>
    %c0_19 = arith.constant 0 : index
    %c0_20 = arith.constant 0 : index
    %41 = vector.load %arg5[%c0_19, %c0_20] : memref<384x128xbf16, #tpu.memory_space<vmem>>, vector<384x128xbf16>
    %cst_21 = arith.constant dense<0.000000e+00> : vector<16x128xf32>
    %42 = tpu.matmul %40, %41, %cst_21 {dimension_numbers = #tpu.dot_dimension_numbers<[1], [0], [0], [1], [0, 0, 1, 1], [], []>} : vector<16x384xbf16>, vector<384x128xbf16>, vector<16x128xf32> -> vector<16x128xf32>
    %43 = vector.broadcast %33 : vector<1x128xf32> to vector<16x128xf32>
    %44 = arith.addf %42, %43 : vector<16x128xf32>
    %c0_22 = arith.constant 0 : index
    %c0_23 = arith.constant 0 : index
    %45 = vector.load %arg7[%c0_22, %c0_23] : memref<1x128xf32, #tpu.memory_space<vmem>>, vector<1x128xf32>
    %c0_24 = arith.constant 0 : index
    %c0_25 = arith.constant 0 : index
    %46 = vector.load %arg8[%c0_24, %c0_25] : memref<1x128xf32, #tpu.memory_space<vmem>>, vector<1x128xf32>
    %cst_26 = arith.constant dense<0.000000e+00> : vector<128xf32>
    %47 = vector.multi_reduction <add>, %44, %cst_26 [0] : vector<16x128xf32> to vector<128xf32>
    %48 = vector.shape_cast %47 : vector<128xf32> to vector<1x128xf32>
    %cst_27 = arith.constant dense<0.000000e+00> : vector<1x128xf32>
    %49 = tpu.matmul %48, %2, %cst_27 {dimension_numbers = #tpu.dot_dimension_numbers<[1], [0], [0], [1], [0, 0, 1, 1], [], []>} : vector<1x128xf32>, vector<128x128xf32>, vector<1x128xf32> -> vector<1x128xf32>
    %cst_28 = arith.constant 9.765625E-4 : f32
    %50 = vector.broadcast %cst_28 : f32 to vector<1x128xf32>
    %51 = arith.mulf %49, %50 : vector<1x128xf32>
    %52 = vector.broadcast %51 : vector<1x128xf32> to vector<16x128xf32>
    %53 = arith.subf %44, %52 : vector<16x128xf32>
    %54 = arith.mulf %53, %53 : vector<16x128xf32>
    %cst_29 = arith.constant dense<0.000000e+00> : vector<128xf32>
    %55 = vector.multi_reduction <add>, %54, %cst_29 [0] : vector<16x128xf32> to vector<128xf32>
    %56 = vector.shape_cast %55 : vector<128xf32> to vector<1x128xf32>
    %cst_30 = arith.constant dense<0.000000e+00> : vector<1x128xf32>
    %57 = tpu.matmul %56, %2, %cst_30 {dimension_numbers = #tpu.dot_dimension_numbers<[1], [0], [0], [1], [0, 0, 1, 1], [], []>} : vector<1x128xf32>, vector<128x128xf32>, vector<1x128xf32> -> vector<1x128xf32>
    %cst_31 = arith.constant 9.765625E-4 : f32
    %58 = vector.broadcast %cst_31 : f32 to vector<1x128xf32>
    %59 = arith.mulf %57, %58 : vector<1x128xf32>
    %cst_32 = arith.constant 9.99999974E-6 : f32
    %60 = vector.broadcast %cst_32 : f32 to vector<1x128xf32>
    %61 = arith.addf %59, %60 : vector<1x128xf32>
    %62 = math.rsqrt %61 : vector<1x128xf32>
    %63 = arith.mulf %62, %45 : vector<1x128xf32>
    %64 = vector.broadcast %63 : vector<1x128xf32> to vector<16x128xf32>
    %65 = arith.mulf %53, %64 : vector<16x128xf32>
    %66 = vector.broadcast %46 : vector<1x128xf32> to vector<16x128xf32>
    %67 = arith.addf %65, %66 : vector<16x128xf32>
    %cst_33 = arith.constant 0.000000e+00 : f32
    %68 = vector.broadcast %cst_33 : f32 to vector<16x128xf32>
    %69 = arith.subf %68, %67 : vector<16x128xf32>
    %70 = math.exp %69 : vector<16x128xf32>
    %cst_34 = arith.constant 1.000000e+00 : f32
    %71 = vector.broadcast %cst_34 : f32 to vector<16x128xf32>
    %72 = arith.addf %71, %70 : vector<16x128xf32>
    %73 = tpu.reciprocal %72 {approx = true} : vector<16x128xf32> -> vector<16x128xf32>
    %74 = arith.mulf %67, %73 : vector<16x128xf32>
    %c0_35 = arith.constant 0 : index
    %c0_36 = arith.constant 0 : index
    %75 = vector.load %arg10[%c0_35, %c0_36] : memref<1x128xf32, #tpu.memory_space<vmem>>, vector<1x128xf32>
    %76 = arith.truncf %74 : vector<16x128xf32> to vector<16x128xbf16>
    %cst_37 = arith.constant 0.000000e+00 : bf16
    %77 = vector.broadcast %cst_37 : bf16 to vector<1x128xbf16>
    %78 = tpu.concatenate %77, %76, %77 in 0 : vector<1x128xbf16>, vector<16x128xbf16>, vector<1x128xbf16> -> vector<18x128xbf16>
    %79 = vector.extract_strided_slice %78 {offsets = [0, 0], sizes = [16, 128], strides = [1, 1]} : vector<18x128xbf16> to vector<16x128xbf16>
    %80 = vector.extract_strided_slice %78 {offsets = [1, 0], sizes = [16, 128], strides = [1, 1]} : vector<18x128xbf16> to vector<16x128xbf16>
    %81 = vector.extract_strided_slice %78 {offsets = [2, 0], sizes = [16, 128], strides = [1, 1]} : vector<18x128xbf16> to vector<16x128xbf16>
    %82 = tpu.concatenate %79, %80, %81 in 1 : vector<16x128xbf16>, vector<16x128xbf16>, vector<16x128xbf16> -> vector<16x384xbf16>
    %c0_38 = arith.constant 0 : index
    %c0_39 = arith.constant 0 : index
    %83 = vector.load %arg9[%c0_38, %c0_39] : memref<384x128xbf16, #tpu.memory_space<vmem>>, vector<384x128xbf16>
    %cst_40 = arith.constant dense<0.000000e+00> : vector<16x128xf32>
    %84 = tpu.matmul %82, %83, %cst_40 {dimension_numbers = #tpu.dot_dimension_numbers<[1], [0], [0], [1], [0, 0, 1, 1], [], []>} : vector<16x384xbf16>, vector<384x128xbf16>, vector<16x128xf32> -> vector<16x128xf32>
    %85 = vector.broadcast %75 : vector<1x128xf32> to vector<16x128xf32>
    %86 = arith.addf %84, %85 : vector<16x128xf32>
    %87 = arith.addf %86, %1 : vector<16x128xf32>
    %c0_41 = arith.constant 0 : index
    %c0_42 = arith.constant 0 : index
    %c0_43 = arith.constant 0 : index
    %88 = vector.load %arg11[%c0_41, %c0_42, %c0_43] : memref<1x16x128xf32, #tpu.memory_space<vmem>>, vector<1x16x128xf32>
    %89 = vector.shape_cast %88 : vector<1x16x128xf32> to vector<16x128xf32>
    %90 = vector.shape_cast %87 : vector<16x128xf32> to vector<1x16x128xf32>
    tpu.vector_store %arg11[%c0_41, %c0_42, %c0_43], %90 {strides = array<i32>} : memref<1x16x128xf32, #tpu.memory_space<vmem>>, vector<1x16x128xf32>,
    return
  }
  func.func @transform_0(%arg0: i32) -> (i32, i32, i32) {
    %c0_i32 = arith.constant 0 : i32
    %c0_i32_0 = arith.constant 0 : i32
    %c0_i32_1 = arith.constant 0 : i32
    return %arg0, %c0_i32, %c0_i32_0 : i32, i32, i32
  }
  func.func @transform_1(%arg0: i32) -> (i32, i32) {
    %c0_i32 = arith.constant 0 : i32
    %c0_i32_0 = arith.constant 0 : i32
    %c0_i32_1 = arith.constant 0 : i32
    return %c0_i32, %c0_i32_0 : i32, i32
  }
  func.func @transform_2(%arg0: i32) -> (i32, i32) {
    %c0_i32 = arith.constant 0 : i32
    %c0_i32_0 = arith.constant 0 : i32
    %c0_i32_1 = arith.constant 0 : i32
    return %c0_i32, %c0_i32_0 : i32, i32
  }
  func.func @transform_3(%arg0: i32) -> (i32, i32) {
    %c0_i32 = arith.constant 0 : i32
    %c0_i32_0 = arith.constant 0 : i32
    %c0_i32_1 = arith.constant 0 : i32
    return %c0_i32, %c0_i32_0 : i32, i32
  }
  func.func @transform_4(%arg0: i32) -> (i32, i32) {
    %c0_i32 = arith.constant 0 : i32
    %c0_i32_0 = arith.constant 0 : i32
    %c0_i32_1 = arith.constant 0 : i32
    return %c0_i32, %c0_i32_0 : i32, i32
  }
  func.func @transform_5(%arg0: i32) -> (i32, i32) {
    %c0_i32 = arith.constant 0 : i32
    %c0_i32_0 = arith.constant 0 : i32
    %c0_i32_1 = arith.constant 0 : i32
    return %c0_i32, %c0_i32_0 : i32, i32
  }
  func.func @transform_6(%arg0: i32) -> (i32, i32) {
    %c0_i32 = arith.constant 0 : i32
    %c0_i32_0 = arith.constant 0 : i32
    %c0_i32_1 = arith.constant 0 : i32
    return %c0_i32, %c0_i32_0 : i32, i32
  }
  func.func @transform_7(%arg0: i32) -> (i32, i32) {
    %c0_i32 = arith.constant 0 : i32
    %c0_i32_0 = arith.constant 0 : i32
    %c0_i32_1 = arith.constant 0 : i32
    return %c0_i32, %c0_i32_0 : i32, i32
  }
  func.func @transform_8(%arg0: i32) -> (i32, i32) {
    %c0_i32 = arith.constant 0 : i32
    %c0_i32_0 = arith.constant 0 : i32
    %c0_i32_1 = arith.constant 0 : i32
    return %c0_i32, %c0_i32_0 : i32, i32
  }
  func.func @transform_9(%arg0: i32) -> (i32, i32) {
    %c0_i32 = arith.constant 0 : i32
    %c0_i32_0 = arith.constant 0 : i32
    %c0_i32_1 = arith.constant 0 : i32
    return %c0_i32, %c0_i32_0 : i32, i32
  }
  func.func @transform_10(%arg0: i32) -> (i32, i32, i32) {
    %c0_i32 = arith.constant 0 : i32
    %c0_i32_0 = arith.constant 0 : i32
    %c0_i32_1 = arith.constant 0 : i32
    return %arg0, %c0_i32, %c0_i32_0 : i32, i32, i32
  }
}

</mosaic_0001>

<bundles_post_ra>
// kernel: tpu_custom_call.1
= control target key start
LH: loop header
LB: loop body
LE: loop exit
PB: predicated region body
PF: predicated region fallthrough
CT: control target
= control target key end

     0   :  { %s2839_s0 = inlined_call_operand.hbm [shape: f32[2,16,128], index: 0, kind: input, shape index: {}]   ;;  %s2840_s1 = inlined_call_operand.hbm [shape: f32[128,128], index: 1, kind: input, shape index: {}]   ;;  %s2841_s2 = inlined_call_operand.vmem [shape: f32[1,128], index: 2, kind: input, shape index: {}]   ;;  %s2842_s3 = inlined_call_operand.vmem [shape: f32[1,128], index: 3, kind: input, shape index: {}]   ;;  %s2843_s4 = inlined_call_operand.hbm [shape: bf16[384,128], index: 4, kind: input, shape index: {}]   ;;  %s2844_s5 = inlined_call_operand.vmem [shape: f32[1,128], index: 5, kind: input, shape index: {}]   ;;  %s2845_s6 = inlined_call_operand.vmem [shape: f32[1,128], index: 6, kind: input, shape index: {}]   ;;  %s2846_s7 = inlined_call_operand.vmem [shape: f32[1,128], index: 7, kind: input, shape index: {}]   ;;  %s2847_s8 = inlined_call_operand.hbm [shape: bf16[384,128], index: 8, kind: input, shape index: {}]   ;;  %s2848_s9 = inlined_call_operand.vmem [shape: f32[1,128], index: 9, kind: input, shape index: {}]   ;;  %s2849_s10 = inlined_call_operand.hbm [shape: f32[2,16,128], index: 10, kind: output, shape index: {}]  }
   0x1   :  { %2856 = sst [smem:[#allocation16_spill]] %s2840_s1 }
   0x2   :  { %2857 = sst [smem:[#allocation17_spill]] %s2843_s4 }
   0x3   :  { %2858 = sst [smem:[#allocation18_spill]] %s2847_s8 }
   0x4   :  { %15 = vsyncpa [#allocation3], 0 }
   0x5   :  { %17 = vsyncpa [#allocation3 + $0x1], 0 }
   0x6   :  { %18 = vsyncpa [#allocation6], 0 }
   0x7   :  { %19 = vsyncpa [#allocation9], 0 }
   0x8   :  { %20 = vsyncpa [#allocation4], 0 }
   0x9   :  { %22 = vsyncpa [#allocation4 + $0x1], 0  ;;  %s2367_s13 = smov 0   ;;  %s2369_s14 = smov 0  }
   0xa   :  { %s2371_s15 = smov 0   ;;  %s2373_s16 = smov 0  }
   0xb LB: > { %s2388_s17 = sadd.s32 4294967295, %s2297_s16   ;;  %s1580_s18 = sadd.s32 4294967294, %s2297_s16   ;;  %s2297_s16 = sphi %s2373_s16, %s2886_s16   ;;  %s2293_s15 = sphi %s2371_s15, %s2885_s15   ;;  %s2289_s14 = sphi %s2369_s14, %s2884_s14   ;;  %s2285_s13 = sphi %s2367_s13, %s2883_s13  }
   0xc   : > { %p48_p0 = scmp.ne.s32.totalorder %s2289_s14, %s2285_s13  ;;  %p2852_p1 = scmp.eq.s32.totalorder %s2388_s17, 0 }
   0xd   : > { %p261_p2 = scmp.eq.s32.totalorder %s2388_s17, 1  ;;  %p267_p3 = scmp.eq.s32.totalorder %s1580_s18, 1 }
   0xe   : > { %p2397_p4 = por %p2852_p1, %p48_p0  ;;  %p1581_p5 = scmp.ge.s32.totalorder %s2297_s16, 1 }
   0xf   : > { %p2402_p6 = por %p267_p3, %p48_p0  ;;  %p274_p7 = scmp.lt.s32.totalorder %s2297_s16, 3 }
  0x10   : > { %s2859_s19 = scalar_select %p2397_p4, 1, 0 }
  0x11   : > { %s2860_s20 = scalar_select %p2402_p6, 1, 0 }
  0x12   : > { %p2407_p8 = pnand %p1581_p5, %p274_p7  ;;  %s2299_s22 = smov [#allocation5]  }
  0x13   : > { %s286_s23 = sshll.u32 %s2299_s22, 4  ;;  %s2300_s25 = smov [#allocation7]   ;;  %s287_s23 = int_to_ptr.vmem [resolvable:$true] %s286_s23 }
  0x14   : > { %s2861_s21 = scalar_select %p2407_p8, 1, 0 }
  0x15   : > { %p1980_p9 = pneg %p2407_p8  ;;  %s305_s26 = sshll.u32 %s2300_s25, 4  ;;  %s306_s26 = int_to_ptr.vmem [resolvable:$true] %s305_s26 }
  0x16   : > { %s2130_s27 = scalar_lea.vmem %s287_s23, 2048  ;;  %p2138_p5 = scmp.lt.s32.totalorder %s287_s23, %s287_s23 }
  0x17   : > { %p2416_p11 = pnand %p1980_p9, %p2852_p1  ;;  %p2131_p13 = scmp.ne.s32.totalorder %s287_s23, %s2130_s27 }
  0x18   : > { %p2139_p7 = scmp.lt.s32.totalorder %s2130_s27, %s2130_s27 }
  0x19   : > { %p2121_p12 = pneg %p2416_p11 }
  0x1a   : > { %p2140_p10 = por %p2139_p7, %p2138_p5 }
  0x1b   : > { %p2133_p0 = pnand %p2131_p13, %p2121_p12 }
  0x1d   : > { %p2134_p3 = pneg %p2133_p0 }
  0x1f   : > { %p2141_p9 = pnand %p2140_p10, %p2134_p3 }
  0x21   : > { %2144 = shalt.err (!%p2141_p9)
}
  0x22   : > { %s2850_s28 = smov 128   ;;  %s2851_s29 = smov 8  }
  0x23   : > { %s2863_s1 = sld [smem:[#allocation16_spill]]  ;;  %s2156_s12 = scalar_lea.vmem %s306_s26, 3072 }
  0x24   : > { %p2157_p13 = scmp.ne.s32.totalorder %s306_s26, %s2156_s12  ;;  %p2164_p10 = scmp.lt.s32.totalorder %s306_s26, %s306_s26 }
  0x25   : > { %p2165_p3 = scmp.lt.s32.totalorder %s2156_s12, %s2156_s12 }
  0x26   : > { %p2159_p0 = pnand %p2157_p13, %p2121_p12 }
  0x27   : > { %p2166_p7 = por %p2165_p3, %p2164_p10 }
  0x28   : > { %p2160_p5 = pneg %p2159_p0 }
  0x29   : > { %1983 = dma.hbm_to_vmem [thread:$0]  (!%p2416_p11), %s2863_s1, 2048, %s287_s23, [#allocation6], %s2850_s28, %s2850_s28, %s2851_s29  }
  0x2a   : > { %p2167_p9 = pnand %p2166_p7, %p2160_p5 }
  0x2c   : > { %2170 = shalt.err (!%p2167_p9)
}
  0x2d   : > { %s2303_s18 = smov 64   ;;  %s2304_s22 = smov 4  }
  0x2e   : > { %s2864_s4 = sld [smem:[#allocation17_spill]]  ;;  %s2305_s23 = smov [#allocation8]  }
  0x2f   : > { %s327_s30 = sshll.u32 %s2305_s23, 4  ;;  %s2442_s11 = sadd.s32 1, %s2297_s16   ;;  %s328_s30 = int_to_ptr.vmem [resolvable:$true] %s327_s30 }
  0x30   : > { %s2182_s28 = scalar_lea.vmem %s328_s30, 3072  ;;  %p2190_p10 = scmp.lt.s32.totalorder %s328_s30, %s328_s30 }
  0x31   : > { %p2183_p13 = scmp.ne.s32.totalorder %s328_s30, %s2182_s28  ;;  %p2191_p3 = scmp.lt.s32.totalorder %s2182_s28, %s2182_s28 }
  0x33   : > { %p2185_p0 = pnand %p2183_p13, %p2121_p12  ;;  %p2192_p7 = por %p2191_p3, %p2190_p10 }
  0x34   : > { %1986 = dma.hbm_to_vmem [thread:$0]  (!%p2416_p11), %s2864_s4, 3072, %s306_s26, [#allocation6], %s2303_s18, %s2303_s18, %s2304_s22  }
  0x35   : > { %p2186_p5 = pneg %p2185_p0 }
  0x37   : > { %p2193_p9 = pnand %p2192_p7, %p2186_p5 }
  0x39   : > { %2196 = shalt.err (!%p2193_p9)
}
  0x3a   : > { %s2865_s8 = sld [smem:[#allocation18_spill]]  ;;  %s32_s28 = ssub.s32 %s2297_s16, %s2442_s11 }
  0x3b   : > { %s35_s25 = sadd.s32 1, %s2293_s15  ;;  %p33_p12 = scmp.eq.s32.totalorder %s32_s28, 0 }
  0x3c   : > { %p42_p13 = scmp.ne.s32.totalorder %s2293_s15, %s2289_s14  ;;  %p43_p0 = scmp.eq.s32.totalorder %s2297_s16, 0 }
  0x3d   : > { %p2001_p5 = scmp.lt.s32.totalorder %s2297_s16, 2  ;;  %s344_s23 = sand.u32 1, %s2293_s15  }
  0x3e   : > { %s2460_s24 = scalar_select %p33_p12, %s2293_s15, %s35_s25  }
  0x3f   : > { %p44_p10 = por %p43_p0, %p42_p13  ;;  %p2464_p3 = por %p261_p2, %p42_p13 }
  0x40   : > { %1989 = dma.hbm_to_vmem [thread:$0]  (!%p2416_p11), %s2865_s8, 3072, %s328_s30, [#allocation9], %s2303_s18, %s2303_s18, %s2304_s22  }
  0x41   : > { %2866 = sst [smem:[#allocation15_spill]] %s2460_s24  ;;  %s1652_s12 = sshll.u32 %s2297_s16, 8 }
  0x42   : > { %s2867_s27 = scalar_select %p2464_p3, 1, 0 }
  0x43   : > { %s1586_s26 = sshll.u32 %s344_s23, 4  ;;  %s2473_s18 = scalar_lea.hbm %s2839_s0, %s1652_s12 }
  0x44   : > { %s348_s22 = scalar_lea.vmem [#allocation2], %s1586_s26  ;;  %p2475_p11 = pnand %p2001_p5, %p44_p10 }
  0x45   : > { %s355_s30 = sshll.u32 %s348_s22, 4  ;;  %s2481_s25 = scalar_lea.sflag [#allocation3], %s344_s23  ;;  %s2479_s30 = int_to_ptr.vmem [resolvable:$true] %s355_s30 }
  0x46   : > { %s2197_s4 = scalar_lea.hbm %s2473_s18, 256  ;;  %p2199_p7 = pneg %p2475_p11 }
  0x47   : > { %p2198_p2 = scmp.ne.s32.totalorder %s2473_s18, %s2197_s4  ;;  %s2202_s12 = scalar_lea.hbm %s2839_s0, 512 }
  0x48   : > { %p2203_p13 = scmp.lt.s32.totalorder %s2473_s18, %s2839_s0  ;;  %p2204_p0 = scmp.lt.s32.totalorder %s2202_s12, %s2197_s4 }
  0x49   : > { %p2200_p9 = pnand %p2199_p7, %p2198_p2 }
  0x4a   : > { %p2205_p5 = por %p2204_p0, %p2203_p13 }
  0x4b   : > { %p2201_p12 = pneg %p2200_p9 }
  0x4d   : > { %p2206_p10 = pnand %p2205_p5, %p2201_p12 }
  0x4f   : > { %2209 = shalt.err (!%p2206_p10)
}
  0x50   : > { %s2210_s23 = scalar_lea.vmem %s2479_s30, 256  ;;  %s2306_s8 = smov [#allocation2]  }
  0x51   : > { %p2211_p1 = scmp.ne.s32.totalorder %s2479_s30, %s2210_s23  ;;  %s2215_s24 = sshll.u32 %s2306_s8, 4  ;;  %s2216_s24 = int_to_ptr.vmem [resolvable:$false] %s2215_s24 }
  0x52   : > { %s2217_s1 = scalar_lea.vmem %s2216_s24, 512  ;;  %p2218_p9 = scmp.lt.s32.totalorder %s2479_s30, %s2216_s24 }
  0x53   : > { %p2213_p6 = pnand %p2211_p1, %p2199_p7  ;;  %p2219_p3 = scmp.lt.s32.totalorder %s2217_s1, %s2210_s23 }
  0x55   : > { %p2214_p2 = pneg %p2213_p6  ;;  %p2220_p4 = por %p2219_p3, %p2218_p9 }
  0x57   : > { %p2221_p8 = pnand %p2220_p4, %p2214_p2 }
  0x59   : > { %2224 = shalt.err (!%p2221_p8)
}
  0x5a   : > { %s2869_s4 = smov 8   ;;  %s2870_s29 = smov 128  }
  0x5b   : > { %1993 = dma.hbm_to_vmem [thread:$0]  (!%p2475_p11), %s2473_s18, 256, %s2479_s30, %s2481_s25, %s2870_s29, %s2870_s29, %s2869_s4  }
  0x5c   : > { %p2871_p1 = scmp.ne.s32.totalorder %s2861_s21, 0 }
  0x5d   : > { %s2508_s8 = sand.u32 (!%p2871_p1), 1, %s2289_s14   ;;  %p2872_p4 = scmp.ne.s32.totalorder (!%p2871_p1), %s2859_s19, 0 }
  0x5e   : > { %367 = sbr.rel (%p2871_p1) target bundleno = 1556 (0x614), region = 60  ;;  %s1590_s24 = sshll.u32 (!%p2871_p1), %s2508_s8, 4 }
  0x5f   : > { %s370_s12 = scalar_lea.sflag (!%p2871_p1), [#allocation3], %s2508_s8  ;;  %s2514_s28 = scalar_lea.vmem (!%p2871_p1), [#allocation2], %s1590_s24 }
  0x63   : > { %2268 = dma.done.wait (%p2872_p4), %s370_s12, 256  }
  0x64   : > { %2270 = vsyncadd (%p2872_p4), %s370_s12, 4294967040  ;;  %p2873_p6 = scmp.eq.s32.totalorder %s2388_s17, 0 }
  0x66   : > { %2272 = dma.done.wait (%p2873_p6), [#allocation6], 5120   ;;  %p2874_p8 = pmov %p2873_p6 }
  0x67   : > { %p2875_p3 = pmov %p2873_p6 }
  0x68   : > { %2274 = vsyncadd (%p2874_p8), [#allocation6], 4294962176 }
  0x69   : > { %2276 = dma.done.wait (%p2875_p3), [#allocation9], 3072   ;;  %p2876_p11 = pmov %p2875_p3 }
  0x6a   : > { %v2307_v0 = vmov 0.0   ;;  %vm2308_vm0 = vmmov 0   ;;  %v2534_v1 = vld [vmem:[#allocation5 + $0x78] sm:$0xff]  ;;  %v2536_v2 = vld [vmem:[#allocation5 + $0x70] sm:$0xff]  ;;  %v2541_v3 = vld [vmem:[#allocation5 + $0x68] sm:$0xff]  ;;  %v521_v26 = vlaneseq  ;;  %vm647_vm1 = vcmask 1040384  }
  0x6b   : > { %2278 = vsyncadd (%p2876_p11), [#allocation9], 4294964224  ;;  %1784 = vmatprep.subr.mxu0 %v2307_v0  ;;  %1816 = vmatprep.mubr.msk.f32.mxu0 %vm2308_vm0, %v2307_v0  ;;  %v2547_v4 = vld [vmem:[#allocation5 + $0x60] sm:$0xff]  ;;  %v2551_v5 = vld [vmem:[#allocation5 + $0x58] sm:$0xff]  ;;  %vm648_vm2 = vsmask.f32 256 }
  0x6c   : > { %1819 = vmatprep.subr.mxu1 %v2307_v0  ;;  %1851 = vmatprep.mubr.msk.f32.mxu1 %vm2308_vm0, %v2307_v0  ;;  %v2554_v6 = vld [vmem:[%s2514_s28] sm:$0xff]  ;;  %v2557_v7 = vld [vmem:[%s2514_s28 + $0x8] sm:$0xff]  ;;  %v522_v27 = vshrl.u32 %v521_v26, 7  ;;  %vm2670_vm3 = vmand %vm647_vm1, %vm648_vm2  ;;  %vm668_vm4 = vcmask 1046528   ;;  %vm652_vm5 = vsmask.f32 7424 }
  0x6d   : > { %1785 = vmatpush3.msra.mxu0 %v2534_v1  ;;  %1820 = vmatpush3.msra.mxu1 %v2534_v1  ;;  %v2561_v8 = vld [vmem:[#allocation5 + $0x50] sm:$0xff]  ;;  %v443_v9 = vadd.f32 %v2557_v7, %v2554_v6  ;;  %v2569_v10 = vld [vmem:[#allocation5 + $0x48] sm:$0xff]  ;;  %v2575_v12 = vld [vmem:[#allocation5 + $0x40] sm:$0xff]  ;;  %s421_s19 = scalar_lea.vmem [#allocation10], %s1590_s24  ;;  %s1653_s18 = sshll.u32 %s2388_s17, 8 }
  0x6e   : > { %1786 = vmatprep.subr.mxu0 %v2307_v0  ;;  %1821 = vmatprep.subr.mxu1 %v2307_v0  ;;  %v2581_v14 = vld [vmem:[#allocation5 + $0x38] sm:$0xff]  ;;  %v2587_v16 = vld [vmem:[#allocation5 + $0x30] sm:$0xff]  ;;  %v2593_v18 = vld [vmem:[#allocation5 + $0x28] sm:$0xff]  ;;  %v2637_v28 = vsub.s32 0, %v522_v27  ;;  %s1478_s21 = sshll.u32 %s421_s19, 4  ;;  %s2793_s26 = scalar_lea.hbm %s2849_s10, %s1653_s18  ;;  %s2795_s21 = int_to_ptr.vmem [resolvable:$true] %s1478_s21 }
  0x6f   : > { %1787 = vmatpush3.msra.mxu0 %v2536_v2  ;;  %1822 = vmatpush3.msra.mxu1 %v2536_v2  ;;  %v444_v11 = vrot.slane %v443_v9, 4  ;;  %v2599_v20 = vld [vmem:[#allocation5 + $0x20] sm:$0xff]  ;;  %v2605_v21 = vld [vmem:[#allocation5 + $0x18] sm:$0xff]  ;;  %v2611_v22 = vld [vmem:[#allocation5 + $0x10] sm:$0xff]  ;;  %s1465_s22 = scalar_lea.sflag [#allocation4], %s2508_s8  ;;  %s2225_s24 = scalar_lea.vmem %s2795_s21, 256 }
  0x70   : > { %1788 = vmatprep.subr.mxu0 %v2307_v0  ;;  %1823 = vmatprep.subr.mxu1 %v2307_v0  ;;  %v2617_v23 = vld [vmem:[#allocation5 + $0x8] sm:$0xff]  ;;  %v2623_v24 = vld [vmem:[#allocation5] sm:$0xff]  ;;  %v2049_v44 = vld [vmem:[#allocation7 + $0xb8] sm:$0xff]   ;;  %p2226_p7 = scmp.ne.s32.totalorder %s2795_s21, %s2225_s24  ;;  %p2879_p12 = scmp.ne.s32.totalorder %s2867_s27, 0 }
  0x71   : > { %1789 = vmatpush3.msra.mxu0 %v2541_v3  ;;  %1824 = vmatpush3.msra.mxu1 %v2541_v3  ;;  %v445_v13 = vadd.f32 %v444_v11, %v443_v9  ;;  %v2050_v45 = vld [vmem:[#allocation7 + $0x78] sm:$0xff]   ;;  %v2053_v47 = vld [vmem:[#allocation7 + $0x70] sm:$0xff]   ;;  %v2056_v50 = vld [vmem:[#allocation7 + $0x68] sm:$0xff]   ;;  %s2309_s17 = smov [#allocation10]  }
  0x72   : > { %1790 = vmatprep.subr.mxu0 %v2307_v0  ;;  %1825 = vmatprep.subr.mxu1 %v2307_v0  ;;  %v2052_v46 = vld [vmem:[#allocation7 + $0x38] sm:$0xff]   ;;  %v2051_v48 = vld [vmem:[#allocation7 + $0xb0] sm:$0xff]   ;;  %v2054_v51 = vld [vmem:[#allocation7 + $0xa8] sm:$0xff]   ;;  %p2227_p13 = pnand %p2226_p7, %p2879_p12  ;;  %s2229_s23 = sshll.u32 %s2309_s17, 4  ;;  %s2230_s23 = int_to_ptr.vmem [resolvable:$false] %s2229_s23 }
  0x73   : > { %1791 = vmatpush3.msra.mxu0 %v2547_v4  ;;  %1826 = vmatpush3.msra.mxu1 %v2547_v4  ;;  %v446_v15 = vrot.slane %v445_v13, 2  ;;  %v2055_v49 = vld [vmem:[#allocation7 + $0x30] sm:$0xff]   ;;  %v2058_v52 = vld [vmem:[#allocation7 + $0x28] sm:$0xff]   ;;  %v2059_v53 = vld [vmem:[#allocation7 + $0x60] sm:$0xff]   ;;  %s2231_s1 = scalar_lea.vmem %s2230_s23, 512  ;;  %p2232_p5 = scmp.lt.s32.totalorder %s2795_s21, %s2230_s23 }
  0x74   : > { %1792 = vmatprep.subr.mxu0 %v2307_v0  ;;  %1827 = vmatprep.subr.mxu1 %v2307_v0  ;;  %v2057_v54 = vld [vmem:[#allocation7 + $0xa0] sm:$0xff]   ;;  %v2062_v56 = vld [vmem:[#allocation7 + $0x58] sm:$0xff]   ;;  %v2065_v59 = vld [vmem:[#allocation7 + $0x50] sm:$0xff]   ;;  %p2228_p0 = pneg %p2227_p13  ;;  %p2233_p10 = scmp.lt.s32.totalorder %s2231_s1, %s2225_s24 }
  0x75   : > { %1793 = vmatpush3.msra.mxu0 %v2551_v5  ;;  %1828 = vmatpush3.msra.mxu1 %v2551_v5  ;;  %v447_v17 = vadd.f32 %v446_v15, %v445_v13  ;;  %v2061_v55 = vld [vmem:[#allocation7 + $0x20] sm:$0xff]   ;;  %v2060_v57 = vld [vmem:[#allocation7 + $0x98] sm:$0xff]   ;;  %v2063_v60 = vld [vmem:[#allocation7 + $0x90] sm:$0xff]  }
  0x76   : > { %1794 = vmatprep.subr.mxu0 %v2307_v0  ;;  %1829 = vmatprep.subr.mxu1 %v2307_v0  ;;  %v2064_v58 = vld [vmem:[#allocation7 + $0x18] sm:$0xff]   ;;  %v2067_v61 = vld [vmem:[#allocation7 + $0x10] sm:$0xff]   ;;  %v2068_v62 = vld [vmem:[#allocation7 + $0x48] sm:$0xff]   ;;  %p2234_p2 = por %p2233_p10, %p2232_p5 }
  0x77   : > { %1795 = vmatpush3.msra.mxu0 %v2561_v8  ;;  %1830 = vmatpush3.msra.mxu1 %v2561_v8  ;;  %v448_v19 = vrot.slane %v447_v17, 1  ;;  %v2066_v63 = vld [vmem:[#allocation7 + $0x88] sm:$0xff]   ;;  %v2071_v9 = vld [vmem:[#allocation7 + $0x40] sm:$0xff]  }
  0x78   : > { %1796 = vmatprep.subr.mxu0 %v2307_v0  ;;  %1831 = vmatprep.subr.mxu1 %v2307_v0  ;;  %v2072_v11 = vld [vmem:[#allocation7] sm:$0xff]   ;;  %p2235_p9 = pnand %p2234_p2, %p2228_p0 }
  0x79   : > { %1797 = vmatpush3.msra.mxu0 %v2569_v10  ;;  %1832 = vmatpush3.msra.mxu1 %v2569_v10  ;;  %v449_v25 = vadd.f32 %v448_v19, %v447_v17 }
  0x7a   : > { %1798 = vmatprep.subr.mxu0 %v2307_v0  ;;  %1833 = vmatprep.subr.mxu1 %v2307_v0 }
  0x7b   : > { %1799 = vmatpush3.msra.mxu0 %v2575_v12  ;;  %1834 = vmatpush3.msra.mxu1 %v2575_v12 }
  0x7c   : > { %1800 = vmatprep.subr.mxu0 %v2307_v0  ;;  %1835 = vmatprep.subr.mxu1 %v2307_v0 }
  0x7d   : > { %1801 = vmatpush3.msra.mxu0 %v2581_v14  ;;  %1836 = vmatpush3.msra.mxu1 %v2581_v14 }
  0x7e   : > { %1802 = vmatprep.subr.mxu0 %v2307_v0  ;;  %1837 = vmatprep.subr.mxu1 %v2307_v0 }
  0x7f   : > { %1803 = vmatpush3.msra.mxu0 %v2587_v16  ;;  %1838 = vmatpush3.msra.mxu1 %v2587_v16 }
  0x80   : > { %1804 = vmatprep.subr.mxu0 %v2307_v0  ;;  %1839 = vmatprep.subr.mxu1 %v2307_v0 }
  0x81   : > { %1805 = vmatpush3.msra.mxu0 %v2593_v18  ;;  %1840 = vmatpush3.msra.mxu1 %v2593_v18 }
  0x82   : > { %1806 = vmatprep.subr.mxu0 %v2307_v0  ;;  %1841 = vmatprep.subr.mxu1 %v2307_v0 }
  0x83   : > { %1807 = vmatpush3.msra.mxu0 %v2599_v20  ;;  %1842 = vmatpush3.msra.mxu1 %v2599_v20 }
  0x84   : > { %1808 = vmatprep.subr.mxu0 %v2307_v0  ;;  %1843 = vmatprep.subr.mxu1 %v2307_v0 }
  0x85   : > { %1809 = vmatpush3.msra.mxu0 %v2605_v21  ;;  %1844 = vmatpush3.msra.mxu1 %v2605_v21 }
  0x86   : > { %1810 = vmatprep.subr.mxu0 %v2307_v0  ;;  %1845 = vmatprep.subr.mxu1 %v2307_v0 }
  0x87   : > { %1811 = vmatpush3.msra.mxu0 %v2611_v22  ;;  %1846 = vmatpush3.msra.mxu1 %v2611_v22 }
  0x88   : > { %1812 = vmatprep.subr.mxu0 %v2307_v0  ;;  %1847 = vmatprep.subr.mxu1 %v2307_v0 }
  0x89   : > { %1813 = vmatpush3.msra.mxu0 %v2617_v23  ;;  %1848 = vmatpush3.msra.mxu1 %v2617_v23 }
  0x8a   : > { %1814 = vmatprep.subr.mxu0 %v2307_v0  ;;  %1849 = vmatprep.subr.mxu1 %v2307_v0 }
  0x8b   : > { %1815 = vmatpush3.msra.mxu0 %v2623_v24  ;;  %1850 = vmatpush3.msra.mxu1 %v2623_v24 }
  0x8c   : > { %1817 = vmatmul.mubr.f32.vlgmr.msra.gmra.mxu0 %v449_v25  ;;  %1854 = vmatprep.subr.bf16.mxu1 %v2307_v0  ;;  %v441_v25 = vld [vmem:[%s2841_s2] sm:$0x1] }
  0x8d   : > { %1688 = vmatprep.subr.bf16.mxu0 %v2050_v45 }
  0x8e   : > { %1689 = vmatpush3.bf16.msra.mxu0 %v2052_v46 }
  0x8f   : > { %1690 = vmatprep.subr.bf16.mxu0 %v2053_v47 }
  0x92   : > { %1691 = vmatpush3.bf16.msra.mxu0 %v2055_v49 }
  0x93   : > { %1692 = vmatprep.subr.bf16.mxu0 %v2056_v50 }
  0x96   : > { %1693 = vmatpush3.bf16.msra.mxu0 %v2058_v52 }
  0x97   : > { %1694 = vmatprep.subr.bf16.mxu0 %v2059_v53 }
  0x9a   : > { %1695 = vmatpush3.bf16.msra.mxu0 %v2061_v55 }
  0x9b   : > { %1696 = vmatprep.subr.bf16.mxu0 %v2062_v56 }
  0x9e   : > { %1697 = vmatpush3.bf16.msra.mxu0 %v2064_v58 }
  0x9f   : > { %1698 = vmatprep.subr.bf16.mxu0 %v2065_v59 }
  0xa2   : > { %1699 = vmatpush3.bf16.msra.mxu0 %v2067_v61 }
  0xa3   : > { %1700 = vmatprep.subr.bf16.mxu0 %v2068_v62 }
 0x14c   : > { %v516_v29 = vpop.f32.mrf.mxu0 }
 0x14d   : > { %v520_v30 = vmul.f32 0.0009765625, %v516_v29 }
 0x14e   : > { %v1818_v31 = vpop.f32.mrf.mxu0 }
 0x14f   : > { %v524_v32 = vrot.slane %v520_v30, %v2637_v28  ;;  %v1595_v30 = vld [vmem:[%s2842_s3] ss:$0 sm:$0xff] }
 0x151   : > { %v2641_v33 = vsub.f32 %v2554_v6, %v524_v32  ;;  %v2644_v34 = vsub.f32 %v2557_v7, %v524_v32  ;;  %v2070_v6 = vld [vmem:[#allocation7 + $0x8] sm:$0xff]   ;;  %v2069_v7 = vld [vmem:[#allocation7 + $0x80] sm:$0xff]  }
 0x152   : > { %1701 = vmatpush3.bf16.msra.mxu0 %v2070_v6 }
 0x153   : > { %v527_v35 = vmul.f32 %v2641_v33, %v2641_v33  ;;  %v528_v36 = vmul.f32 %v2644_v34, %v2644_v34  ;;  %1702 = vmatprep.subr.bf16.mxu0 %v2071_v9 }
 0x155   : > { %v529_v37 = vadd.f32 %v528_v36, %v527_v35 }
 0x156   : > { %1703 = vmatpush3.bf16.msra.mxu0 %v2072_v11 }
 0x157   : > { %v530_v38 = vrot.slane %v529_v37, 4  ;;  %1874 = vmatprep.subr.mxu0 %v2307_v0 }
 0x159   : > { %v531_v39 = vadd.f32 %v530_v38, %v529_v37 }
 0x15b   : > { %v532_v40 = vrot.slane %v531_v39, 2 }
 0x15d   : > { %v533_v41 = vadd.f32 %v532_v40, %v531_v39 }
 0x15f   : > { %v534_v42 = vrot.slane %v533_v41, 1 }
 0x161   : > { %v535_v43 = vadd.f32 %v534_v42, %v533_v41 }
 0x163   : > { %1852 = vmatmul.mubr.f32.vlgmr.msra.gmra.mxu1 %v535_v43 }
 0x164   : > { %1870 = vmatprep.mubr.msk.bf16.mxu1 %vm2308_vm0, %v2307_v0  ;;  %1855 = vmatpush3.bf16.msra.mxu1 %v2049_v44 }
 0x165   : > { %1856 = vmatprep.subr.bf16.mxu1 %v2307_v0 }
 0x168   : > { %1857 = vmatpush3.bf16.msra.mxu1 %v2051_v48 }
 0x169   : > { %1858 = vmatprep.subr.bf16.mxu1 %v2307_v0 }
 0x16c   : > { %1859 = vmatpush3.bf16.msra.mxu1 %v2054_v51 }
 0x16d   : > { %1860 = vmatprep.subr.bf16.mxu1 %v2307_v0 }
 0x170   : > { %1861 = vmatpush3.bf16.msra.mxu1 %v2057_v54 }
 0x171   : > { %1862 = vmatprep.subr.bf16.mxu1 %v2307_v0 }
 0x174   : > { %1863 = vmatpush3.bf16.msra.mxu1 %v2060_v57 }
 0x175   : > { %1864 = vmatprep.subr.bf16.mxu1 %v2307_v0 }
 0x178   : > { %1865 = vmatpush3.bf16.msra.mxu1 %v2063_v60 }
 0x179   : > { %1866 = vmatprep.subr.bf16.mxu1 %v2307_v0 }
 0x17c   : > { %1867 = vmatpush3.bf16.msra.mxu1 %v2066_v63 }
 0x17d   : > { %1868 = vmatprep.subr.bf16.mxu1 %v2307_v0 }
 0x180   : > { %1869 = vmatpush3.bf16.msra.mxu1 %v2069_v7 }
 0x181   : > { %1909 = vmatprep.subr.mxu1 %v2307_v0 }
 0x223   : > { %v602_v13 = vpop.f32.mrf.mxu1 }
 0x224   : > { %v606_v15 = vmul.f32 0.0009765625, %v602_v13 }
 0x225   : > { %v1853_v17 = vpop.f32.mrf.mxu1 }
 0x226   : > { %v607_v19 = vadd.f32 1e-05, %v606_v15 }
 0x228   : > { %2097 = vrsqrt.f32 %v607_v19 }
 0x235   : > { %v2098_v26 = vpop.eup %2097 }
 0x236   : > { %v609_v27 = vmul.f32 %v2098_v26, %v441_v25 }
 0x238   : > { %v613_v29 = vrot.slane %v609_v27, %v2637_v28 }
 0x23a   : > { %v614_v31 = vmul.f32 %v613_v29, %v2641_v33  ;;  %v615_v32 = vmul.f32 %v613_v29, %v2644_v34 }
 0x23c   : > { %v622_v35 = vadd.f32 %v1595_v30, %v614_v31  ;;  %v623_v36 = vadd.f32 %v1595_v30, %v615_v32 }
 0x23e   : > { %v624_v37 = vsub.f32 0.0, %v622_v35  ;;  %v625_v38 = vsub.f32 0.0, %v623_v36 }
 0x240   : > { %v626_v39 = vmul.f32 1.442695, %v624_v37  ;;  %v628_v40 = vmul.f32 1.442695, %v625_v38 }
 0x242   : > { %2099 = vpow2.f32 %v626_v39 }
 0x243   : > { %2101 = vpow2.f32 %v628_v40 }
 0x24f   : > { %v2100_v41 = vpop.eup %2099 }
 0x250   : > { %v2102_v42 = vpop.eup %2101  ;;  %v630_v43 = vadd.f32 1.0, %v2100_v41 }
 0x251   : > { %v631_v44 = vadd.f32 1.0, %v2102_v42  ;;  %v2073_v42 = vld [vmem:[#allocation8 + $0xb8] sm:$0xff]  }
 0x252   : > { %2103 = vrcp.f32 %v630_v43  ;;  %v2074_v43 = vld [vmem:[#allocation8 + $0x78] sm:$0xff]  }
 0x253   : > { %2105 = vrcp.f32 %v631_v44  ;;  %v2076_v44 = vld [vmem:[#allocation8 + $0x38] sm:$0xff]  }
 0x25f   : > { %v2104_v45 = vpop.eup %2103 }
 0x260   : > { %v2106_v46 = vpop.eup %2105  ;;  %v634_v47 = vmul.f32 %v2104_v45, %v622_v35  ;;  %v2077_v45 = vld [vmem:[#allocation8 + $0x70] sm:$0xff]  }
 0x261   : > { %v635_v33 = vmul.f32 %v2106_v46, %v623_v36  ;;  %v2075_v46 = vld [vmem:[#allocation8 + $0xb0] sm:$0xff]  }
 0x263   : > { %v637_v48 = vpack.c.bf16 %v635_v33, %v634_v47  ;;  %v2079_v47 = vld [vmem:[#allocation8 + $0x30] sm:$0xff]   ;;  %v2080_v33 = vld [vmem:[#allocation8 + $0x68] sm:$0xff]  }
 0x265   : > { %v639_v34 = vshrl.u32 %v637_v48, 16  ;;  %v642_v51 = vshll.u32 %v637_v48, 16  ;;  %v2078_v48 = vld [vmem:[#allocation8 + $0xa8] sm:$0xff]  }
 0x267   : > { %v641_v50 = vrot.slane %v639_v34, 7  ;;  %v2082_v34 = vld [vmem:[#allocation8 + $0x28] sm:$0xff]  }
 0x269   : > { %v644_v52 = vor.u32 %v642_v51, %v641_v50  ;;  %v651_v53 = vsel %vm2670_vm3, %v641_v50, 0  ;;  %v2083_v50 = vld [vmem:[#allocation8 + $0x60] sm:$0xff]  }
 0x26a   : > { %v670_v56 = vrot.slane %v651_v53, 1  ;;  %v661_v58 = vshll.u32 %v651_v53, 16  ;;  %v2081_v51 = vld [vmem:[#allocation8 + $0xa0] sm:$0xff]   ;;  %v2086_v53 = vld [vmem:[#allocation8 + $0x58] sm:$0xff]  }
 0x26b   : > { %v650_v54 = vsel %vm2670_vm3, 0, %v644_v52  ;;  %v2085_v52 = vld [vmem:[#allocation8 + $0x20] sm:$0xff]  }
 0x26c   : > { %v669_v55 = vrot.slane %v650_v54, 1  ;;  %v656_v57 = vshll.u32 %v650_v54, 16  ;;  %v654_v60 = vshrl.u32 %v650_v54, 16  ;;  %v663_v63 = vrot.slane %v661_v58, 1  ;;  %v2091_v58 = vld [vmem:[#allocation8 + $0x10] sm:$0xff]  }
 0x26e   : > { %v671_v59 = vsel %vm668_vm4, %v669_v55, %v670_v56  ;;  %v658_v61 = vrot.slane %v656_v57, 1  ;;  %v2088_v55 = vld [vmem:[#allocation8 + $0x18] sm:$0xff]   ;;  %v2089_v56 = vld [vmem:[#allocation8 + $0x50] sm:$0xff]  }
 0x26f   : > { %1871 = vmatmul.mubr.bf16.vlgmr.msra.gmra.mxu1 %v671_v59  ;;  %v2087_v57 = vld [vmem:[#allocation8 + $0x90] sm:$0xff]   ;;  %v2092_v59 = vld [vmem:[#allocation8 + $0x48] sm:$0xff]  }
 0x270   : > { %v659_v62 = vor.u32 %v658_v61, %v654_v60  ;;  %1910 = vmatpush3.msra.mxu1 %v2534_v1  ;;  %1941 = vmatprep.mubr.msk.f32.mxu1 %vm2308_vm0, %v2307_v0  ;;  %v2090_v60 = vld [vmem:[#allocation8 + $0x88] sm:$0xff]  }
 0x271   : > { %1911 = vmatprep.subr.mxu1 %v2307_v0  ;;  %v2094_v61 = vld [vmem:[#allocation8 + $0x8] sm:$0xff]  }
 0x272   : > { %v664_v6 = vsel %vm652_vm5, %v659_v62, %v663_v63  ;;  %1912 = vmatpush3.msra.mxu1 %v2536_v2  ;;  %v2093_v62 = vld [vmem:[#allocation8 + $0x80] sm:$0xff]  }
 0x273   : > { %903 = vmatprep.mubr.bf16.mxu0 %v664_v6  ;;  %1913 = vmatprep.subr.mxu1 %v2307_v0  ;;  %v2095_v63 = vld [vmem:[#allocation8 + $0x40] sm:$0xff]  }
 0x274   : > { %904 = vmatmul.mubr.bf16.vlgmr.msra.gmra.mxu0 %v650_v54  ;;  %1914 = vmatpush3.msra.mxu1 %v2541_v3  ;;  %v2084_v54 = vld [vmem:[#allocation8 + $0x98] sm:$0xff]   ;;  %v2096_v6 = vld [vmem:[#allocation8] sm:$0xff]  }
 0x275   : > { %1875 = vmatpush3.msra.mxu0 %v2534_v1  ;;  %1906 = vmatprep.mubr.msk.f32.mxu0 %vm2308_vm0, %v2307_v0 }
 0x276   : > { %1876 = vmatprep.subr.mxu0 %v2307_v0  ;;  %1915 = vmatprep.subr.mxu1 %v2307_v0 }
 0x277   : > { %1877 = vmatpush3.msra.mxu0 %v2536_v2  ;;  %1916 = vmatpush3.msra.mxu1 %v2547_v4 }
 0x278   : > { %1878 = vmatprep.subr.mxu0 %v2307_v0  ;;  %1917 = vmatprep.subr.mxu1 %v2307_v0 }
 0x279   : > { %1879 = vmatpush3.msra.mxu0 %v2541_v3  ;;  %1918 = vmatpush3.msra.mxu1 %v2551_v5 }
 0x27a   : > { %1880 = vmatprep.subr.mxu0 %v2307_v0  ;;  %1919 = vmatprep.subr.mxu1 %v2307_v0 }
 0x27b   : > { %1881 = vmatpush3.msra.mxu0 %v2547_v4  ;;  %1920 = vmatpush3.msra.mxu1 %v2561_v8 }
 0x27c   : > { %1882 = vmatprep.subr.mxu0 %v2307_v0  ;;  %1921 = vmatprep.subr.mxu1 %v2307_v0 }
 0x27d   : > { %1883 = vmatpush3.msra.mxu0 %v2551_v5  ;;  %1922 = vmatpush3.msra.mxu1 %v2569_v10 }
 0x27e   : > { %1884 = vmatprep.subr.mxu0 %v2307_v0  ;;  %1923 = vmatprep.subr.mxu1 %v2307_v0 }
 0x27f   : > { %1885 = vmatpush3.msra.mxu0 %v2561_v8  ;;  %1924 = vmatpush3.msra.mxu1 %v2575_v12 }
 0x280   : > { %1886 = vmatprep.subr.mxu0 %v2307_v0  ;;  %1925 = vmatprep.subr.mxu1 %v2307_v0 }
 0x281   : > { %1887 = vmatpush3.msra.mxu0 %v2569_v10  ;;  %1926 = vmatpush3.msra.mxu1 %v2581_v14 }
 0x282   : > { %1888 = vmatprep.subr.mxu0 %v2307_v0  ;;  %1927 = vmatprep.subr.mxu1 %v2307_v0 }
 0x283   : > { %1889 = vmatpush3.msra.mxu0 %v2575_v12  ;;  %1928 = vmatpush3.msra.mxu1 %v2587_v16  ;;  %v1596_v12 = vld [vmem:[%s2844_s5] ss:$0 sm:$0xff] }
 0x284   : > { %1890 = vmatprep.subr.mxu0 %v2307_v0  ;;  %1929 = vmatprep.subr.mxu1 %v2307_v0 }
 0x285   : > { %1891 = vmatpush3.msra.mxu0 %v2581_v14  ;;  %1930 = vmatpush3.msra.mxu1 %v2593_v18 }
 0x286   : > { %1892 = vmatprep.subr.mxu0 %v2307_v0  ;;  %1931 = vmatprep.subr.mxu1 %v2307_v0 }
 0x287   : > { %1893 = vmatpush3.msra.mxu0 %v2587_v16  ;;  %1932 = vmatpush3.msra.mxu1 %v2599_v20 }
 0x288   : > { %1894 = vmatprep.subr.mxu0 %v2307_v0  ;;  %1933 = vmatprep.subr.mxu1 %v2307_v0 }
 0x289   : > { %1895 = vmatpush3.msra.mxu0 %v2593_v18  ;;  %1934 = vmatpush3.msra.mxu1 %v2605_v21 }
 0x28a   : > { %1896 = vmatprep.subr.mxu0 %v2307_v0  ;;  %1935 = vmatprep.subr.mxu1 %v2307_v0 }
 0x28b   : > { %1897 = vmatpush3.msra.mxu0 %v2599_v20  ;;  %1936 = vmatpush3.msra.mxu1 %v2611_v22 }
 0x28c   : > { %1898 = vmatprep.subr.mxu0 %v2307_v0  ;;  %1937 = vmatprep.subr.mxu1 %v2307_v0 }
 0x28d   : > { %1899 = vmatpush3.msra.mxu0 %v2605_v21  ;;  %1938 = vmatpush3.msra.mxu1 %v2617_v23 }
 0x28e   : > { %1900 = vmatprep.subr.mxu0 %v2307_v0  ;;  %1939 = vmatprep.subr.mxu1 %v2307_v0 }
 0x28f   : > { %1901 = vmatpush3.msra.mxu0 %v2611_v22  ;;  %1940 = vmatpush3.msra.mxu1 %v2623_v24 }
 0x290   : > { %1902 = vmatprep.subr.mxu0 %v2307_v0  ;;  %1944 = vmatprep.subr.bf16.mxu1 %v2307_v0 }
 0x291   : > { %1903 = vmatpush3.msra.mxu0 %v2617_v23 }
 0x292   : > { %1904 = vmatprep.subr.mxu0 %v2307_v0 }
 0x293   : > { %1905 = vmatpush3.msra.mxu0 %v2623_v24 }
 0x294   : > { %1753 = vmatprep.subr.bf16.mxu0 %v2074_v43 }
 0x32f   : > { %v946_v1 = vpop.f32.mrf.mxu1 }
 0x331   : > { %v1872_v2 = vpop.f32.mrf.mxu1 }
 0x333   : > { %v949_v3 = vpop.f32.mrf.mxu1 }
 0x334   : > { %v1704_v4 = vpop.f32.mrf.mxu0 }
 0x335   : > { %v1873_v5 = vpop.f32.mrf.mxu1 }
 0x336   : > { %v1705_v8 = vpop.f32.mrf.mxu0  ;;  %v953_v5 = vld [vmem:[%s2845_s6] sm:$0x1] }
 0x337   : > { %v1706_v10 = vadd.f32 %v1705_v8, %v1704_v4 }
 0x338   : > { %v1707_v14 = vpop.f32.mrf.mxu0 }
 0x339   : > { %v906_v18 = vadd.f32 %v1706_v10, %v1596_v12 }
 0x33a   : > { %v1708_v16 = vpop.f32.mrf.mxu0 }
 0x33b   : > { %v1709_v20 = vadd.f32 %v1708_v16, %v1707_v14  ;;  %v947_v22 = vadd.f32 %v946_v1, %v906_v18 }
 0x33d   : > { %v909_v21 = vadd.f32 %v1709_v20, %v1596_v12 }
 0x33f   : > { %v950_v23 = vadd.f32 %v949_v3, %v909_v21 }
 0x341   : > { %v955_v7 = vadd.f32 %v950_v23, %v947_v22 }
 0x343   : > { %v956_v24 = vrot.slane %v955_v7, 4 }
 0x345   : > { %v957_v9 = vadd.f32 %v956_v24, %v955_v7 }
 0x347   : > { %v958_v11 = vrot.slane %v957_v9, 2 }
 0x349   : > { %v959_v13 = vadd.f32 %v958_v11, %v957_v9 }
 0x34b   : > { %v960_v15 = vrot.slane %v959_v13, 1 }
 0x34d   : > { %v961_v17 = vadd.f32 %v960_v15, %v959_v13 }
 0x34f   : > { %1907 = vmatmul.mubr.f32.vlgmr.msra.gmra.mxu0 %v961_v17 }
 0x350   : > { %1754 = vmatpush3.bf16.msra.mxu0 %v2076_v44 }
 0x351   : > { %1755 = vmatprep.subr.bf16.mxu0 %v2077_v45 }
 0x354   : > { %1756 = vmatpush3.bf16.msra.mxu0 %v2079_v47 }
 0x355   : > { %1757 = vmatprep.subr.bf16.mxu0 %v2080_v33 }
 0x358   : > { %1758 = vmatpush3.bf16.msra.mxu0 %v2082_v34 }
 0x359   : > { %1759 = vmatprep.subr.bf16.mxu0 %v2083_v50 }
 0x35c   : > { %1760 = vmatpush3.bf16.msra.mxu0 %v2085_v52 }
 0x35d   : > { %1761 = vmatprep.subr.bf16.mxu0 %v2086_v53 }
 0x360   : > { %1762 = vmatpush3.bf16.msra.mxu0 %v2088_v55 }
 0x361   : > { %1763 = vmatprep.subr.bf16.mxu0 %v2089_v56  ;;  %v2117_v56 = vld [vmem:[%s2514_s28] sm:$0xff] }
 0x364   : > { %1764 = vmatpush3.bf16.msra.mxu0 %v2091_v58 }
 0x365   : > { %1765 = vmatprep.subr.bf16.mxu0 %v2092_v59 }
 0x368   : > { %1766 = vmatpush3.bf16.msra.mxu0 %v2094_v61 }
 0x369   : > { %1767 = vmatprep.subr.bf16.mxu0 %v2095_v63 }
 0x36c   : > { %1768 = vmatpush3.bf16.msra.mxu0 %v2096_v6 }
 0x40f   : > { %v1028_v19 = vpop.f32.mrf.mxu0 }
 0x410   : > { %v1032_v25 = vmul.f32 0.0009765625, %v1028_v19 }
 0x411   : > { %v1908_v26 = vpop.f32.mrf.mxu0 }
 0x412   : > { %v1036_v27 = vrot.slane %v1032_v25, %v2637_v28 }
 0x414   : > { %v2751_v29 = vsub.f32 %v947_v22, %v1036_v27  ;;  %v2753_v30 = vsub.f32 %v950_v23, %v1036_v27 }
 0x416   : > { %v1039_v31 = vmul.f32 %v2751_v29, %v2751_v29  ;;  %v1040_v32 = vmul.f32 %v2753_v30, %v2753_v30 }
 0x418   : > { %v1041_v35 = vadd.f32 %v1040_v32, %v1039_v31 }
 0x41a   : > { %v1042_v36 = vrot.slane %v1041_v35, 4 }
 0x41c   : > { %v1043_v37 = vadd.f32 %v1042_v36, %v1041_v35 }
 0x41e   : > { %v1044_v38 = vrot.slane %v1043_v37, 2 }
 0x420   : > { %v1045_v39 = vadd.f32 %v1044_v38, %v1043_v37 }
 0x422   : > { %v1046_v40 = vrot.slane %v1045_v39, 1 }
 0x424   : > { %v1047_v41 = vadd.f32 %v1046_v40, %v1045_v39 }
 0x426   : > { %1942 = vmatmul.mubr.f32.vlgmr.msra.gmra.mxu1 %v1047_v41 }
 0x427   : > { %1960 = vmatprep.mubr.msk.bf16.mxu1 %vm2308_vm0, %v2307_v0  ;;  %1945 = vmatpush3.bf16.msra.mxu1 %v2073_v42 }
 0x428   : > { %1946 = vmatprep.subr.bf16.mxu1 %v2307_v0 }
 0x42b   : > { %1947 = vmatpush3.bf16.msra.mxu1 %v2075_v46 }
 0x42c   : > { %1948 = vmatprep.subr.bf16.mxu1 %v2307_v0 }
 0x42f   : > { %1949 = vmatpush3.bf16.msra.mxu1 %v2078_v48  ;;  %v1622_v48 = vld [vmem:[%s2848_s9] ss:$0 sm:$0xff] }
 0x430   : > { %1950 = vmatprep.subr.bf16.mxu1 %v2307_v0 }
 0x433   : > { %1951 = vmatpush3.bf16.msra.mxu1 %v2081_v51 }
 0x434   : > { %1952 = vmatprep.subr.bf16.mxu1 %v2307_v0 }
 0x437   : > { %1953 = vmatpush3.bf16.msra.mxu1 %v2084_v54 }
 0x438   : > { %1954 = vmatprep.subr.bf16.mxu1 %v2307_v0 }
 0x43b   : > { %1955 = vmatpush3.bf16.msra.mxu1 %v2087_v57 }
 0x43c   : > { %1956 = vmatprep.subr.bf16.mxu1 %v2307_v0 }
 0x43f   : > { %1957 = vmatpush3.bf16.msra.mxu1 %v2090_v60  ;;  %v2118_v60 = vld [vmem:[%s2514_s28 + $0x8] sm:$0xff] }
 0x440   : > { %1958 = vmatprep.subr.bf16.mxu1 %v2307_v0  ;;  %v1621_v0 = vld [vmem:[%s2846_s7] ss:$0 sm:$0xff] }
 0x443   : > { %1959 = vmatpush3.bf16.msra.mxu1 %v2093_v62 }
 0x4e6   : > { %v1114_v1 = vpop.f32.mrf.mxu1 }
 0x4e7   : > { %v1118_v2 = vmul.f32 0.0009765625, %v1114_v1 }
 0x4e8   : > { %v1943_v3 = vpop.f32.mrf.mxu1 }
 0x4e9   : > { %v1119_v4 = vadd.f32 1e-05, %v1118_v2 }
 0x4eb   : > { %2107 = vrsqrt.f32 %v1119_v4 }
 0x4f8   : > { %v2108_v8 = vpop.eup %2107 }
 0x4f9   : > { %v1121_v10 = vmul.f32 %v2108_v8, %v953_v5 }
 0x4fb   : > { %v1125_v12 = vrot.slane %v1121_v10, %v2637_v28 }
 0x4fd   : > { %v1126_v14 = vmul.f32 %v1125_v12, %v2751_v29  ;;  %v1127_v16 = vmul.f32 %v1125_v12, %v2753_v30 }
 0x4ff   : > { %v1134_v18 = vadd.f32 %v1621_v0, %v1126_v14  ;;  %v1135_v20 = vadd.f32 %v1621_v0, %v1127_v16 }
 0x501   : > { %v1136_v21 = vsub.f32 0.0, %v1134_v18  ;;  %v1137_v22 = vsub.f32 0.0, %v1135_v20 }
 0x503   : > { %v1138_v23 = vmul.f32 1.442695, %v1136_v21  ;;  %v1140_v7 = vmul.f32 1.442695, %v1137_v22 }
 0x505   : > { %2109 = vpow2.f32 %v1138_v23 }
 0x506   : > { %2111 = vpow2.f32 %v1140_v7 }
 0x512   : > { %v2110_v24 = vpop.eup %2109 }
 0x513   : > { %v2112_v9 = vpop.eup %2111  ;;  %v1142_v11 = vadd.f32 1.0, %v2110_v24 }
 0x514   : > { %v1143_v28 = vadd.f32 1.0, %v2112_v9 }
 0x515   : > { %2113 = vrcp.f32 %v1142_v11 }
 0x516   : > { %2115 = vrcp.f32 %v1143_v28 }
 0x522   : > { %v2114_v13 = vpop.eup %2113 }
 0x523   : > { %v2116_v15 = vpop.eup %2115  ;;  %v1146_v17 = vmul.f32 %v2114_v13, %v1134_v18 }
 0x524   : > { %v1147_v19 = vmul.f32 %v2116_v15, %v1135_v20 }
 0x526   : > { %v1149_v25 = vpack.c.bf16 %v1147_v19, %v1146_v17 }
 0x528   : > { %v1151_v26 = vshrl.u32 %v1149_v25, 16  ;;  %v1154_v29 = vshll.u32 %v1149_v25, 16 }
 0x52a   : > { %v1153_v27 = vrot.slane %v1151_v26, 7 }
 0x52c   : > { %v1156_v30 = vor.u32 %v1154_v29, %v1153_v27  ;;  %v1160_v31 = vsel %vm2670_vm3, %v1153_v27, 0 }
 0x52d   : > { %v1177_v36 = vrot.slane %v1160_v31, 1  ;;  %v1169_v38 = vshll.u32 %v1160_v31, 16 }
 0x52e   : > { %v1159_v32 = vsel %vm2670_vm3, 0, %v1156_v30 }
 0x52f   : > { %v1176_v35 = vrot.slane %v1159_v32, 1  ;;  %v1164_v37 = vshll.u32 %v1159_v32, 16  ;;  %v1162_v40 = vshrl.u32 %v1159_v32, 16  ;;  %v1171_v43 = vrot.slane %v1169_v38, 1 }
 0x531   : > { %v1178_v39 = vsel %vm668_vm4, %v1176_v35, %v1177_v36  ;;  %v1166_v41 = vrot.slane %v1164_v37, 1 }
 0x532   : > { %1961 = vmatmul.mubr.bf16.vlgmr.msra.gmra.mxu1 %v1178_v39 }
 0x533   : > { %v1167_v42 = vor.u32 %v1166_v41, %v1162_v40 }
 0x535   : > { %v1172_v44 = vsel %vm652_vm5, %v1167_v42, %v1171_v43 }
 0x536   : > { %1410 = vmatprep.mubr.bf16.mxu0 %v1172_v44 }
 0x537   : > { %1411 = vmatmul.mubr.bf16.vlgmr.msra.gmra.mxu0 %v1159_v32 }
 0x5f2   : > { %v1453_v45 = vpop.f32.mrf.mxu1 }
 0x5f4   : > { %v1962_v49 = vpop.f32.mrf.mxu1 }
 0x5f6   : > { %v1456_v46 = vpop.f32.mrf.mxu1 }
 0x5f7   : > { %v1769_v47 = vpop.f32.mrf.mxu0 }
 0x5f8   : > { %v1963_v33 = vpop.f32.mrf.mxu1 }
 0x5f9   : > { %v1770_v34 = vpop.f32.mrf.mxu0 }
 0x5fa   : > { %v1771_v50 = vadd.f32 %v1770_v34, %v1769_v47 }
 0x5fb   : > { %v1772_v51 = vpop.f32.mrf.mxu0 }
 0x5fc   : > { %v1413_v52 = vadd.f32 %v1771_v50, %v1622_v48 }
 0x5fd   : > { %v1773_v53 = vpop.f32.mrf.mxu0 }
 0x5fe   : > { %v1454_v54 = vadd.f32 %v1453_v45, %v1413_v52  ;;  %v1774_v55 = vadd.f32 %v1773_v53, %v1772_v51 }
 0x600   : > { %v1460_v57 = vadd.f32 %v2117_v56, %v1454_v54  ;;  %v1416_v58 = vadd.f32 %v1774_v55, %v1622_v48 }
 0x602   : > { %1462 = vst [vmem:[%s421_s19] sm:$0xff] %v1460_v57  ;;  %v1457_v59 = vadd.f32 %v1456_v46, %v1416_v58 }
 0x604   : > { %v1461_v61 = vadd.f32 %v2118_v60, %v1457_v59 }
 0x606   : > { %1463 = vst [vmem:[%s421_s19 + $0x8] sm:$0xff] %v1461_v61 }
 0x607   : > { %2238 = shalt.err (!%p2235_p9)
}
 0x608   : > { %s2239_s28 = scalar_lea.hbm %s2793_s26, 256  ;;  %s2243_s12 = scalar_lea.hbm %s2849_s10, 512 }
 0x609   : > { %p2240_p1 = scmp.ne.s32.totalorder %s2793_s26, %s2239_s28  ;;  %p2244_p8 = scmp.lt.s32.totalorder %s2793_s26, %s2849_s10 }
 0x60a   : > { %p2245_p3 = scmp.lt.s32.totalorder %s2243_s12, %s2239_s28 }
 0x60b   : > { %p2241_p4 = pnand %p2240_p1, %p2879_p12 }
 0x60c   : > { %p2246_p11 = por %p2245_p3, %p2244_p8 }
 0x60d   : > { %p2242_p6 = pneg %p2241_p4 }
 0x60f   : > { %p2247_p7 = pnand %p2246_p11, %p2242_p6 }
 0x611   : > { %2250 = shalt.err (!%p2247_p7)
}
 0x612   : > { %s2310_s30 = smov 128   ;;  %s2311_s25 = smov 8  }
 0x613   : > { %1978 = dma.vmem_to_hbm [thread:$0]  (%p2879_p12), %s2795_s21, 256, %s2793_s26, %s1465_s22, %s2310_s30, %s2310_s30, %s2311_s25  }
 0x614 PF: > { %s1493_s24 = sand.u32 1, %s2285_s13   ;;  %p2880_p13 = scmp.ne.s32.totalorder %s2860_s20, 0 }
 0x615   : > { %p2881_p0 = scmp.ge.s32.totalorder %s2297_s16, 2  ;;  %s1494_s17 = scalar_lea.sflag [#allocation4], %s1493_s24 }
 0x617   : > { %p1995_p5 = pnand %p2881_p0, %p2880_p13 }
 0x619   : > { %p1996_p10 = pneg %p1995_p5 }
 0x61b   : > { %2280 = dma.done.wait (%p1996_p10), %s1494_s17, 256  }
 0x61c   : > { %2282 = vsyncadd (%p1996_p10), %s1494_s17, 4294967040  ;;  %s2882_s23 = sld [smem:[#allocation15_spill]]  ;;  %p25_p2 = scmp.ge.s32.totalorder %s2442_s11, 4  }
 0x61d   : > { %s2883_s13 = smov %s2289_s14  ;;  %s2884_s14 = smov %s2293_s15 }
 0x61e   : > { %s2886_s16 = smov %s2442_s11  ;;  %27 = sbr.rel (!%p25_p2) target bundleno = 11 (0xb), region = 117 }
 0x622   : > { %s2885_s15 = smov %s2882_s23 }
 0x623   :  { %1499 = vsyncpa [#allocation3], 1 }
 0x624   :  { %1501 = vsyncpa [#allocation3 + $0x1], 1 }
 0x625   :  { %1502 = vsyncpa [#allocation6], 1 }
 0x626   :  { %1503 = vsyncpa [#allocation9], 1 }
 0x627   :  { %1504 = vsyncpa [#allocation4], 1 }
 0x628   :  { %1506 = vsyncpa [#allocation4 + $0x1], 1 }

</bundles_post_ra>
